<compile_context>
chip_gen: v7x
topology: tpu7x:2x2x1
jax: 0.10.0
libtpu: 0.0.40
codegen_flags: <defaults>
</compile_context>

<pallas_src>
import math

import jax
import jax.numpy as jnp
from jax import lax
from jax.experimental import pallas as pl
from jax.experimental.pallas import tpu as pltpu


def classifier_kernel(x_ref, w_ref, b_ref, o_ref):
    # logits^T[c, r] = sum_k W[c, k] * x[r, k]  -> (nclass, tm) on the MXU, f32 accumulate.
    logits = lax.dot_general(
        w_ref[...], x_ref[...],
        dimension_numbers=(((1,), (1,)), ((), ())),
        preferred_element_type=jnp.float32,
        precision=lax.Precision.HIGHEST,
    ) + b_ref[...]                                    # bias (nclass, 1) broadcasts over lanes

    # Numerically stable log_softmax over the class (sublane) axis.
    m = jnp.max(logits, axis=0, keepdims=True)        # (1, tm) sublane reduce (XLU)
    shifted = logits - m
    lse = jnp.log(jnp.sum(jnp.exp(shifted), axis=0, keepdims=True))  # exp/log on EUP
    o_ref[...] = (shifted - lse).astype(o_ref.dtype)  # lane-dense (nclass, tm) store


def classifier_forward(x, weight, bias, *, tm=None):
    """x: [N, nhid] f32, weight: [nclass, nhid] (torch Linear layout), bias: [nclass].

    Returns log-probabilities [N, nclass] f32, same semantics as
    `log_softmax(x @ weight.T + bias, dim=-1)`.
    """
    N, nhid = x.shape
    nclass = weight.shape[0]

    x = x.astype(jnp.float32)
    w = weight.astype(jnp.float32)
    b2d = bias.astype(jnp.float32).reshape(nclass, 1)

    if tm is None:
        # Single block for small/medium N (no grid-step overhead).  For large N use
        # 8192-row tiles: ~2.6 MB of HBM traffic per step (good pipeline efficiency),
        # ~2.5 MB of double-buffered VMEM.  The last partial tile is handled by Pallas
        # (OOB reads are row-local garbage; OOB writes are dropped), so no padding pass.
        tm = N if N <= 8192 else 8192
    grid = (pl.cdiv(N, tm),)

    cost = pl.CostEstimate(
        flops=2 * N * nhid * nclass,
        transcendentals=N * (nclass + 1),
        bytes_accessed=(N * nhid + nclass * nhid + nclass + N * nclass) * 4,
    )

    out_t = pl.pallas_call(
        classifier_kernel,
        out_shape=jax.ShapeDtypeStruct((nclass, N), jnp.float32),
        grid_spec=pltpu.PrefetchScalarGridSpec(
            num_scalar_prefetch=0,
            grid=grid,
            in_specs=[
                pl.BlockSpec((tm, nhid), lambda i: (i, 0)),      # x row tile (f32)
                pl.BlockSpec((nclass, nhid), lambda i: (0, 0)),  # full weight, resident
                pl.BlockSpec((nclass, 1), lambda i: (0, 0)),     # bias column (f32)
            ],
            out_specs=pl.BlockSpec((nclass, tm), lambda i: (0, i)),  # lane-dense output
        ),
        compiler_params=pltpu.CompilerParams(
            dimension_semantics=("parallel",),
        ),
        cost_estimate=cost,
    )(x, w, b2d)

    # Back to the module's [N, nclass] layout (single small XLA transpose pass).
    return out_t.T


if __name__ == "__main__":
    # Small shapes consistent with the module: Classifier(nhid=32, nclass=8)
    N, nhid, nclass = 128, 32, 8

    key = jax.random.PRNGKey(0)
    kx, kw, kb = jax.random.split(key, 3)

    # Deterministic init mimicking torch.nn.Linear.reset_parameters():
    # weight, bias ~ U(-1/sqrt(nhid), 1/sqrt(nhid))
    bound = 1.0 / math.sqrt(nhid)
    weight = jax.random.uniform(kw, (nclass, nhid), jnp.float32, -bound, bound)
    bias = jax.random.uniform(kb, (nclass,), jnp.float32, -bound, bound)

    x = jax.random.normal(kx, (N, nhid), jnp.float32)

    out = jax.block_until_ready(classifier_forward(x, weight, bias))

    # Pure-JAX f32 reference (same math as the torch module's forward).
    ref_logits = jnp.dot(x, weight.T, precision=lax.Precision.HIGHEST) + bias[None, :]
    ref = jax.nn.log_softmax(ref_logits, axis=-1)

    assert out.shape == (N, nclass)
    assert out.dtype == jnp.float32
    assert jnp.allclose(out, ref, atol=5e-3, rtol=5e-3)

    print("KERNEL_OK")
</pallas_src>

<mosaic_0001>
module attributes {stable_mosaic.version = 11 : i64} {
  func.func @classifier_kernel(%arg0: i32, %arg1: memref<128x32xf32, #tpu.memory_space<vmem>>, %arg2: memref<8x32xf32, #tpu.memory_space<vmem>>, %arg3: memref<8x1xf32, #tpu.memory_space<vmem>>, %arg4: memref<8x128xf32, #tpu.memory_space<vmem>>) attributes {dimension_semantics = [#tpu.dimension_semantics<parallel>], iteration_bounds = array<i64: 1>, scalar_prefetch = 0 : i64, scratch_operands = 0 : i64, tpu.core_type = #tpu.core_type<tc>, window_params = [{transform_indices = @transform_0, window_bounds = array<i64: 128, 32>}, {pipeline_mode = #tpu.pipeline_mode<synchronous>, transform_indices = @transform_1, window_bounds = array<i64: 8, 32>}, {pipeline_mode = #tpu.pipeline_mode<synchronous>, transform_indices = @transform_2, window_bounds = array<i64: 8, 1>}, {transform_indices = @transform_3, window_bounds = array<i64: 8, 128>}]} {
    %c0 = arith.constant 0 : index
    %c0_0 = arith.constant 0 : index
    %0 = vector.load %arg2[%c0, %c0_0] : memref<8x32xf32, #tpu.memory_space<vmem>>, vector<8x32xf32>
    %c0_1 = arith.constant 0 : index
    %c0_2 = arith.constant 0 : index
    %1 = vector.load %arg1[%c0_1, %c0_2] : memref<128x32xf32, #tpu.memory_space<vmem>>, vector<128x32xf32>
    %cst = arith.constant dense<0.000000e+00> : vector<8x128xf32>
    %2 = tpu.matmul %0, %1, %cst {dimension_numbers = #tpu.dot_dimension_numbers<[1], [1], [0], [0], [0, 0, 1, 0], [], []>, precision = #tpu.contract_precision<fp32>} : vector<8x32xf32>, vector<128x32xf32>, vector<8x128xf32> -> vector<8x128xf32>
    %c0_3 = arith.constant 0 : index
    %c0_4 = arith.constant 0 : index
    %3 = vector.load %arg3[%c0_3, %c0_4] : memref<8x1xf32, #tpu.memory_space<vmem>>, vector<8x1xf32>
    %4 = vector.broadcast %3 : vector<8x1xf32> to vector<8x128xf32>
    %5 = arith.addf %2, %4 : vector<8x128xf32>
    %cst_5 = arith.constant dense<0xFF800000> : vector<128xf32>
    %6 = vector.multi_reduction <maximumf>, %5, %cst_5 [0] : vector<8x128xf32> to vector<128xf32>
    %7 = vector.shape_cast %6 : vector<128xf32> to vector<1x128xf32>
    %8 = vector.broadcast %7 : vector<1x128xf32> to vector<8x128xf32>
    %9 = arith.subf %5, %8 : vector<8x128xf32>
    %10 = math.exp %9 : vector<8x128xf32>
    %cst_6 = arith.constant dense<0.000000e+00> : vector<128xf32>
    %11 = vector.multi_reduction <add>, %10, %cst_6 [0] : vector<8x128xf32> to vector<128xf32>
    %12 = vector.shape_cast %11 : vector<128xf32> to vector<1x128xf32>
    %13 = math.log %12 : vector<1x128xf32>
    %14 = vector.broadcast %13 : vector<1x128xf32> to vector<8x128xf32>
    %15 = arith.subf %9, %14 : vector<8x128xf32>
    %c0_7 = arith.constant 0 : index
    %c0_8 = arith.constant 0 : index
    %16 = vector.load %arg4[%c0_7, %c0_8] : memref<8x128xf32, #tpu.memory_space<vmem>>, vector<8x128xf32>
    tpu.vector_store %arg4[%c0_7, %c0_8], %15 {strides = array<i32>} : memref<8x128xf32, #tpu.memory_space<vmem>>, vector<8x128xf32>,
    return
  }
  func.func @transform_0(%arg0: i32) -> (i32, i32) {
    %c0_i32 = arith.constant 0 : i32
    %c0_i32_0 = arith.constant 0 : i32
    return %arg0, %c0_i32 : i32, i32
  }
  func.func @transform_1(%arg0: i32) -> (i32, i32) {
    %c0_i32 = arith.constant 0 : i32
    %c0_i32_0 = arith.constant 0 : i32
    %c0_i32_1 = arith.constant 0 : i32
    return %c0_i32, %c0_i32_0 : i32, i32
  }
  func.func @transform_2(%arg0: i32) -> (i32, i32) {
    %c0_i32 = arith.constant 0 : i32
    %c0_i32_0 = arith.constant 0 : i32
    %c0_i32_1 = arith.constant 0 : i32
    return %c0_i32, %c0_i32_0 : i32, i32
  }
  func.func @transform_3(%arg0: i32) -> (i32, i32) {
    %c0_i32 = arith.constant 0 : i32
    %c0_i32_0 = arith.constant 0 : i32
    return %c0_i32, %arg0 : i32, i32
  }
}

</mosaic_0001>

<bundles_post_ra>
// kernel: tpu_custom_call.1
= control target key start
LH: loop header
LB: loop body
LE: loop exit
PB: predicated region body
PF: predicated region fallthrough
CT: control target
= control target key end

     0   :  { %vm38_vm0 = vcmask 261120   ;;  %v1264_v3 = vmov 0.0|0.0   ;;  %s1587_s0 = inlined_call_operand.vmem [shape: f32[128,32], index: 0, kind: input, shape index: {}]   ;;  %s1588_s1 = inlined_call_operand.vmem [shape: f32[8,32], index: 1, kind: input, shape index: {}]   ;;  %s1589_s2 = inlined_call_operand.vmem [shape: f32[8,1], index: 2, kind: input, shape index: {}]   ;;  %s1590_s3 = inlined_call_operand.hbm [shape: f32[8,128], index: 3, kind: output, shape index: {}]  }
   0x1   :  { %v16_v0 = vld [vmem:[%s1587_s0] sm:$0xff]  ;;  %v17_v1 = vld [vmem:[%s1587_s0 + $0x8] sm:$0xff]  ;;  %v18_v2 = vld [vmem:[%s1587_s0 + $0x10] sm:$0xff]  ;;  %1076 = vmatprep.subr.bf16.mxu1 %v1264_v3  ;;  %1148 = vmatprep.subr.bf16.mxu0 %v1264_v3 }
   0x2   :  { %v43_v4 = vsel %vm38_vm0, %v16_v0, 0  ;;  %v46_v5 = vsel %vm38_vm0, %v17_v1, 0  ;;  %v19_v6 = vld [vmem:[%s1587_s0 + $0x18] sm:$0xff]  ;;  %v49_v9 = vsel %vm38_vm0, %v18_v2, 0 }
   0x3   :  { %v91_v7 = vand.u32 4294901760, %v43_v4  ;;  %v94_v8 = vand.u32 4294901760, %v46_v5  ;;  %v52_v10 = vsel %vm38_vm0, %v19_v6, 0  ;;  %v97_v12 = vand.u32 4294901760, %v49_v9 }
   0x4   :  { %v100_v13 = vand.u32 4294901760, %v52_v10 }
   0x5   :  { %v1307_v11 = vpack.c.bf16 %v94_v8, %v91_v7 }
   0x7   :  { %1078 = vmatpush3.bf16.xpose.msra.mxu1 %v1307_v11  ;;  %1150 = vmatpush3.bf16.xpose.msra.mxu0 %v1307_v11 }
   0x8   :  { %1079 = vmatprep.subr.bf16.mxu1 %v1264_v3  ;;  %1151 = vmatprep.subr.bf16.mxu0 %v1264_v3 }
   0x9   :  { %8 = vsyncpa [#allocation3], 0  ;;  %v20_v14 = vld [vmem:[%s1587_s0 + $0x20] sm:$0xff]  ;;  %v21_v15 = vld [vmem:[%s1587_s0 + $0x28] sm:$0xff]  ;;  %v1319_v16 = vpack.c.bf16 %v100_v13, %v97_v12  ;;  %vm1265_vm1 = vmmov 0   ;;  %v1266_v23 = vmov 0.0   ;;  %v1355_v34 = vsub.f32 %v43_v4, %v91_v7 }
   0xa   :  { %v55_v17 = vsel %vm38_vm0, %v20_v14, 0  ;;  %v58_v18 = vsel %vm38_vm0, %v21_v15, 0  ;;  %v22_v21 = vld [vmem:[%s1587_s0 + $0x30] sm:$0xff]  ;;  %v23_v22 = vld [vmem:[%s1587_s0 + $0x38] sm:$0xff]  ;;  %898 = vmatprep.mubr.msk.f32.mxu1 %vm1265_vm1, %v1266_v23  ;;  %1003 = vmatprep.mubr.msk.f32.mxu0 %vm1265_vm1, %v1266_v23  ;;  %v24_v29 = vld [vmem:[%s1587_s0 + $0x40] sm:$0xff]  ;;  %v1357_v35 = vsub.f32 %v46_v5, %v94_v8  ;;  %v1359_v36 = vsub.f32 %v49_v9, %v97_v12 }
   0xb   :  { %v103_v19 = vand.u32 4294901760, %v55_v17  ;;  %v106_v20 = vand.u32 4294901760, %v58_v18  ;;  %v61_v25 = vsel %vm38_vm0, %v22_v21, 0  ;;  %v64_v26 = vsel %vm38_vm0, %v23_v22, 0  ;;  %v25_v30 = vld [vmem:[%s1587_s0 + $0x48] sm:$0xff]  ;;  %v26_v43 = vld [vmem:[%s1587_s0 + $0x50] sm:$0xff] }
   0xc   :  { %v109_v27 = vand.u32 4294901760, %v61_v25  ;;  %v112_v28 = vand.u32 4294901760, %v64_v26  ;;  %v67_v31 = vsel %vm38_vm0, %v24_v29, 0  ;;  %v70_v33 = vsel %vm38_vm0, %v25_v30, 0  ;;  %v27_v44 = vld [vmem:[%s1587_s0 + $0x58] sm:$0xff]  ;;  %v28_v60 = vld [vmem:[%s1587_s0 + $0x60] sm:$0xff] }
   0xd   :  { %v1337_v24 = vpack.c.bf16 %v106_v20, %v103_v19  ;;  %v1361_v37 = vsub.f32 %v52_v10, %v100_v13  ;;  %v115_v38 = vand.u32 4294901760, %v67_v31  ;;  %v1363_v39 = vsub.f32 %v55_v17, %v103_v19  ;;  %v29_v61 = vld [vmem:[%s1587_s0 + $0x68] sm:$0xff]  ;;  %v15_v5 = vld [vmem:[%s1588_s1] sm:$0xff]  ;;  %v30_v8 = vld [vmem:[%s1587_s0 + $0x70] sm:$0xff] }
   0xe   :  { %v1352_v32 = vpack.c.bf16 %v112_v28, %v109_v27  ;;  %v1365_v40 = vsub.f32 %v58_v18, %v106_v20  ;;  %v1367_v41 = vsub.f32 %v61_v25, %v109_v27  ;;  %v118_v42 = vand.u32 4294901760, %v70_v33  ;;  %v31_v9 = vld [vmem:[%s1587_s0 + $0x78] sm:$0xff] }
   0xf   :  { %1081 = vmatpush3.bf16.xpose.msra.mxu1 %v1319_v16  ;;  %1153 = vmatpush3.bf16.xpose.msra.mxu0 %v1319_v16  ;;  %v1376_v45 = vsub.f32 %v64_v26, %v112_v28  ;;  %v1379_v46 = vsub.f32 %v67_v31, %v115_v38  ;;  %v1125_v47 = vpack.c.bf16 %v1357_v35, %v1355_v34  ;;  %v73_v51 = vsel %vm38_vm0, %v26_v43, 0 }
  0x10   :  { %1082 = vmatprep.subr.bf16.mxu1 %v1264_v3  ;;  %1154 = vmatprep.subr.bf16.mxu0 %v1264_v3  ;;  %v1385_v48 = vsub.f32 %v70_v33, %v118_v42  ;;  %v1128_v49 = vpack.c.bf16 %v1361_v37, %v1359_v36  ;;  %v1131_v50 = vpack.c.bf16 %v1365_v40, %v1363_v39  ;;  %v76_v52 = vsel %vm38_vm0, %v27_v44, 0 }
  0x11   :  { %v1134_v53 = vpack.c.bf16 %v1376_v45, %v1367_v41  ;;  %v1397_v55 = vpack.c.bf16 %v118_v42, %v115_v38  ;;  %v121_v56 = vand.u32 4294901760, %v73_v51  ;;  %v124_v57 = vand.u32 4294901760, %v76_v52 }
  0x12   :  { %v1137_v54 = vpack.c.bf16 %v1385_v48, %v1379_v46  ;;  %v79_v63 = vsel %vm38_vm0, %v28_v60, 0  ;;  %v82_v0 = vsel %vm38_vm0, %v29_v61, 0  ;;  %v40_v10 = vsel %vm38_vm0, %v15_v5, 0 }
  0x13   :  { %v1399_v58 = vsub.f32 %v73_v51, %v121_v56  ;;  %v1401_v59 = vsub.f32 %v76_v52, %v124_v57  ;;  %v1417_v1 = vpack.c.bf16 %v124_v57, %v121_v56  ;;  %v127_v2 = vand.u32 4294901760, %v79_v63 }
  0x14   :  { %v130_v4 = vand.u32 4294901760, %v82_v0  ;;  %v85_v13 = vsel %vm38_vm0, %v30_v8, 0  ;;  %v88_v14 = vsel %vm38_vm0, %v31_v9, 0  ;;  %v1441_v15 = vand.u32 4294901760, %v40_v10 }
  0x15   :  { %v1140_v62 = vpack.c.bf16 %v1401_v59, %v1399_v58  ;;  %v1422_v6 = vsub.f32 %v79_v63, %v127_v2  ;;  %v133_v18 = vand.u32 4294901760, %v85_v13  ;;  %v136_v19 = vand.u32 4294901760, %v88_v14 }
  0x16   :  { %v1424_v7 = vsub.f32 %v82_v0, %v130_v4  ;;  %v1443_v17 = vpack.c.bf16 %v130_v4, %v127_v2  ;;  %v1450_v22 = vsub.f32 %v40_v10, %v1441_v15  ;;  %v184_v25 = vand.u32 4294901760, %v1355_v34  ;;  %v32_v4 = vld [vmem:[%s1589_s2] sm:$0xff]  ;;  %s1268_s2 = smov [#allocation2]  }
  0x17   :  { %1084 = vmatpush3.bf16.xpose.msra.mxu1 %v1337_v24  ;;  %1156 = vmatpush3.bf16.xpose.msra.mxu0 %v1337_v24  ;;  %v1445_v20 = vsub.f32 %v85_v13, %v133_v18  ;;  %v1447_v21 = vsub.f32 %v88_v14, %v136_v19  ;;  %v191_v26 = vand.u32 4294901760, %v1357_v35  ;;  %v1461_v29 = vpack.c.bf16 %v136_v19, %v133_v18  ;;  %s756_s19 = sshll.u32 %s1268_s2, 4  ;;  %s757_s19 = int_to_ptr.vmem [resolvable:$true] %s756_s19 }
  0x18   :  { %1085 = vmatprep.subr.bf16.mxu1 %v1264_v3  ;;  %1157 = vmatprep.subr.bf16.mxu0 %v1264_v3  ;;  %v1143_v12 = vpack.c.bf16 %v1424_v7, %v1422_v6  ;;  %v173_v28 = vand.u32 4294901760, %v1450_v22  ;;  %v185_v30 = vsub.f32 %v1355_v34, %v184_v25  ;;  %v198_v43 = vand.u32 4294901760, %v1359_v36  ;;  %s1240_s20 = scalar_lea.vmem %s757_s19, 128  ;;  %p1245_p1 = scmp.lt.s32.totalorder %s757_s19, %s757_s19 }
  0x19   :  { %v1146_v27 = vpack.c.bf16 %v1447_v21, %v1445_v20  ;;  %v192_v31 = vsub.f32 %v1357_v35, %v191_v26  ;;  %v205_v44 = vand.u32 4294901760, %v1361_v37  ;;  %v1173_v56 = vpack.c.bf16 %v191_v26, %v184_v25  ;;  %p1241_p0 = scmp.ne.s32.totalorder %s757_s19, %s1240_s20  ;;  %p1246_p2 = scmp.lt.s32.totalorder %s1240_s20, %s1240_s20 }
  0x1a   :  { %v174_v33 = vsub.f32 %v1450_v22, %v173_v28  ;;  %v186_v38 = vand.u32 4294901760, %v185_v30  ;;  %v199_v57 = vsub.f32 %v1359_v36, %v198_v43  ;;  %v212_v61 = vand.u32 4294901760, %v1363_v39 }
  0x1b   :  { %v193_v42 = vand.u32 4294901760, %v192_v31  ;;  %v206_v60 = vsub.f32 %v1361_v37, %v205_v44  ;;  %v219_v2 = vand.u32 4294901760, %v1365_v40  ;;  %v1267_v5 = vmov 0   ;;  %p1247_p3 = por %p1246_p2, %p1245_p1 }
  0x1c   :  { %v175_v51 = vand.u32 4294901760, %v174_v33  ;;  %v200_v63 = vand.u32 4294901760, %v199_v57  ;;  %1235 = vset.pattern.permute.xlu0 %v1267_v5  ;;  %v1176_v9 = vpack.c.bf16 %v205_v44, %v198_v43  ;;  %v213_v10 = vsub.f32 %v1363_v39, %v212_v61 }
  0x1d   :  { %v1101_v52 = vpack.c.bf16 %v193_v42, %v186_v38  ;;  %v207_v0 = vand.u32 4294901760, %v206_v60  ;;  %v220_v13 = vsub.f32 %v1365_v40, %v219_v2  ;;  %35 = vperm.xlu0 %1235, %v32_v4   ;;  %v226_v19 = vand.u32 4294901760, %v1367_v41  ;;  %p1248_p4 = pnand %p1247_p3, %p1241_p0 }
  0x1e   :  { %v214_v14 = vand.u32 4294901760, %v213_v10  ;;  %v233_v25 = vand.u32 4294901760, %v1376_v45  ;;  %v240_v42 = vand.u32 4294901760, %v1379_v46  ;;  %v247_v43 = vand.u32 4294901760, %v1385_v48 }
  0x1f   :  { %1087 = vmatpush3.bf16.xpose.msra.mxu1 %v1352_v32  ;;  %1159 = vmatpush3.bf16.xpose.msra.mxu0 %v1352_v32  ;;  %v1104_v8 = vpack.c.bf16 %v207_v0, %v200_v63  ;;  %v221_v18 = vand.u32 4294901760, %v220_v13  ;;  %v227_v30 = vsub.f32 %v1367_v41, %v226_v19  ;;  %v261_v63 = vand.u32 4294901760, %v1401_v59 }
  0x20   :  { %1088 = vmatprep.subr.bf16.mxu1 %v1264_v3  ;;  %1160 = vmatprep.subr.bf16.mxu0 %v1264_v3  ;;  %v234_v31 = vsub.f32 %v1376_v45, %v233_v25  ;;  %v268_v10 = vand.u32 4294901760, %v1422_v6  ;;  %v275_v13 = vand.u32 4294901760, %v1424_v7 }
  0x21   :  { %v1107_v26 = vpack.c.bf16 %v221_v18, %v214_v14  ;;  %v228_v33 = vand.u32 4294901760, %v227_v30  ;;  %v262_v5 = vsub.f32 %v1401_v59, %v261_v63  ;;  %v282_v30 = vand.u32 4294901760, %v1445_v20 }
  0x22   :  { %v235_v38 = vand.u32 4294901760, %v234_v31  ;;  %v289_v31 = vand.u32 4294901760, %v1447_v21 }
  0x24   :  { %v1110_v44 = vpack.c.bf16 %v235_v38, %v228_v33  ;;  %v1191_v38 = vpack.c.bf16 %v275_v13, %v268_v10 }
  0x27   :  { %1090 = vmatpush3.bf16.xpose.msra.mxu1 %v1397_v55  ;;  %1162 = vmatpush3.bf16.xpose.msra.mxu0 %v1397_v55 }
  0x28   :  { %1091 = vmatprep.subr.bf16.mxu1 %v1264_v3  ;;  %1163 = vmatprep.subr.bf16.mxu0 %v1264_v3 }
  0x2f   :  { %1093 = vmatpush3.bf16.xpose.msra.mxu1 %v1417_v1  ;;  %1165 = vmatpush3.bf16.xpose.msra.mxu0 %v1417_v1 }
  0x30   :  { %1094 = vmatprep.subr.bf16.mxu1 %v1264_v3  ;;  %1166 = vmatprep.subr.bf16.mxu0 %v1264_v3 }
  0x37   :  { %1096 = vmatpush3.bf16.xpose.msra.mxu1 %v1443_v17  ;;  %1168 = vmatpush3.bf16.xpose.msra.mxu0 %v1443_v17 }
  0x38   :  { %1097 = vmatprep.subr.bf16.mxu1 %v1264_v3  ;;  %1169 = vmatprep.subr.bf16.mxu0 %v1264_v3 }
  0x3f   :  { %1099 = vmatpush3.bf16.xpose.msra.mxu1 %v1461_v29  ;;  %1171 = vmatpush3.bf16.xpose.msra.mxu0 %v1461_v29 }
  0x40   :  { %1100 = vmatprep.subr.bf16.mxu1 %v1264_v3  ;;  %1172 = vmatprep.subr.bf16.mxu0 %v1264_v3 }
  0x46   :  { %899 = vmatmul.mubr.f32.vlgmr.msra.gmra.mrb[0].mxu1 %v175_v51  ;;  %1004 = vmatmul.mubr.f32.vlgmr.msra.gmra.mrb[0].mxu0 %v173_v28  ;;  %v1179_v28 = vpack.c.bf16 %v219_v2, %v212_v61  ;;  %v1182_v51 = vpack.c.bf16 %v233_v25, %v226_v19  ;;  %v254_v61 = vand.u32 4294901760, %v1399_v58  ;;  %v1185_v2 = vpack.c.bf16 %v247_v43, %v240_v42 }
  0x47   :  { %1102 = vmatpush3.bf16.xpose.msra.mxu1 %v1101_v52  ;;  %1174 = vmatpush3.bf16.xpose.msra.mxu0 %v1173_v56  ;;  %v241_v52 = vsub.f32 %v1379_v46, %v240_v42  ;;  %v248_v56 = vsub.f32 %v1385_v48, %v247_v43  ;;  %v269_v19 = vsub.f32 %v1422_v6, %v268_v10 }
  0x48   :  { %1103 = vmatprep.subr.bf16.mxu1 %v1264_v3  ;;  %1175 = vmatprep.subr.bf16.mxu0 %v1264_v3  ;;  %v255_v4 = vsub.f32 %v1399_v58, %v254_v61  ;;  %v1188_v18 = vpack.c.bf16 %v261_v63, %v254_v61  ;;  %v276_v25 = vsub.f32 %v1424_v7, %v275_v13 }
  0x49   :  { %933 = vmatprep.mubr.msk.f32.mxu1 %vm1265_vm1, %v1266_v23  ;;  %1038 = vmatprep.mubr.msk.f32.mxu0 %vm1265_vm1, %v1266_v23  ;;  %v242_v57 = vand.u32 4294901760, %v241_v52  ;;  %v249_v60 = vand.u32 4294901760, %v248_v56  ;;  %v283_v42 = vsub.f32 %v1445_v20, %v282_v30  ;;  %v290_v43 = vsub.f32 %v1447_v21, %v289_v31 }
  0x4a   :  { %v1194_v56 = vpack.c.bf16 %v289_v31, %v282_v30 }
  0x4b   :  { %v1113_v0 = vpack.c.bf16 %v249_v60, %v242_v57 }
  0x4f   :  { %1105 = vmatpush3.bf16.xpose.msra.mxu1 %v1104_v8  ;;  %1177 = vmatpush3.bf16.xpose.msra.mxu0 %v1176_v9  ;;  %v256_v8 = vand.u32 4294901760, %v255_v4  ;;  %v263_v9 = vand.u32 4294901760, %v262_v5 }
  0x50   :  { %1106 = vmatprep.subr.bf16.mxu1 %v1264_v3  ;;  %1178 = vmatprep.subr.bf16.mxu0 %v1264_v3 }
  0x51   :  { %v1116_v14 = vpack.c.bf16 %v263_v9, %v256_v8 }
  0x57   :  { %1108 = vmatpush3.bf16.xpose.msra.mxu1 %v1107_v26  ;;  %1180 = vmatpush3.bf16.xpose.msra.mxu0 %v1179_v28  ;;  %v270_v26 = vand.u32 4294901760, %v269_v19  ;;  %v277_v28 = vand.u32 4294901760, %v276_v25 }
  0x58   :  { %1109 = vmatprep.subr.bf16.mxu1 %v1264_v3  ;;  %1181 = vmatprep.subr.bf16.mxu0 %v1264_v3 }
  0x59   :  { %v1119_v33 = vpack.c.bf16 %v277_v28, %v270_v26 }
  0x5f   :  { %1111 = vmatpush3.bf16.xpose.msra.mxu1 %v1110_v44  ;;  %1183 = vmatpush3.bf16.xpose.msra.mxu0 %v1182_v51  ;;  %v284_v44 = vand.u32 4294901760, %v283_v42  ;;  %v291_v51 = vand.u32 4294901760, %v290_v43 }
  0x60   :  { %1112 = vmatprep.subr.bf16.mxu1 %v1264_v3  ;;  %1184 = vmatprep.subr.bf16.mxu0 %v1264_v3 }
  0x61   :  { %v1122_v52 = vpack.c.bf16 %v291_v51, %v284_v44 }
  0x67   :  { %1114 = vmatpush3.bf16.xpose.msra.mxu1 %v1113_v0  ;;  %1186 = vmatpush3.bf16.xpose.msra.mxu0 %v1185_v2 }
  0x68   :  { %1115 = vmatprep.subr.bf16.mxu1 %v1264_v3  ;;  %1187 = vmatprep.subr.bf16.mxu0 %v1264_v3 }
  0x6f   :  { %1117 = vmatpush3.bf16.xpose.msra.mxu1 %v1116_v14  ;;  %1189 = vmatpush3.bf16.xpose.msra.mxu0 %v1188_v18 }
  0x70   :  { %1118 = vmatprep.subr.bf16.mxu1 %v1264_v3  ;;  %1190 = vmatprep.subr.bf16.mxu0 %v1264_v3 }
  0x77   :  { %1120 = vmatpush3.bf16.xpose.msra.mxu1 %v1119_v33  ;;  %1192 = vmatpush3.bf16.xpose.msra.mxu0 %v1191_v38 }
  0x78   :  { %1121 = vmatprep.subr.bf16.mxu1 %v1264_v3  ;;  %1193 = vmatprep.subr.bf16.mxu0 %v1264_v3 }
  0x7f   :  { %1123 = vmatpush3.bf16.xpose.msra.mxu1 %v1122_v52  ;;  %1195 = vmatpush3.bf16.xpose.msra.mxu0 %v1194_v56 }
  0x80   :  { %1124 = vmatprep.subr.bf16.mxu1 %v1264_v3  ;;  %1196 = vmatprep.subr.bf16.mxu0 %v1264_v3 }
  0x86   :  { %934 = vmatmul.mubr.f32.vlgmr.msra.gmra.mrb[0].mxu1 %v1441_v15  ;;  %1039 = vmatmul.mubr.f32.vlgmr.msra.gmra.mrb[0].mxu0 %v1441_v15 }
  0x87   :  { %1126 = vmatpush3.bf16.xpose.msra.mxu1 %v1125_v47  ;;  %1198 = vmatpush3.bf16.xpose.msra.mxu0 %v1307_v11 }
  0x88   :  { %1127 = vmatprep.subr.bf16.mxu1 %v1264_v3  ;;  %1199 = vmatprep.subr.bf16.mxu0 %v1264_v3 }
  0x89   :  { %968 = vmatprep.mubr.msk.f32.mxu1 %vm1265_vm1, %v1266_v23  ;;  %1073 = vmatprep.mubr.msk.f32.mxu0 %vm1265_vm1, %v1266_v23 }
  0x8f   :  { %1129 = vmatpush3.bf16.xpose.msra.mxu1 %v1128_v49  ;;  %1201 = vmatpush3.bf16.xpose.msra.mxu0 %v1319_v16 }
  0x90   :  { %1130 = vmatprep.subr.bf16.mxu1 %v1264_v3  ;;  %1202 = vmatprep.subr.bf16.mxu0 %v1264_v3 }
  0x97   :  { %1132 = vmatpush3.bf16.xpose.msra.mxu1 %v1131_v50  ;;  %1204 = vmatpush3.bf16.xpose.msra.mxu0 %v1337_v24 }
  0x98   :  { %1133 = vmatprep.subr.bf16.mxu1 %v1264_v3  ;;  %1205 = vmatprep.subr.bf16.mxu0 %v1264_v3 }
  0x9c   :  { %v36_v11 = vpop.permute.xlu0 %35 }
  0x9f   :  { %1135 = vmatpush3.bf16.xpose.msra.mxu1 %v1134_v53  ;;  %1207 = vmatpush3.bf16.xpose.msra.mxu0 %v1352_v32 }
  0xa0   :  { %1136 = vmatprep.subr.bf16.mxu1 %v1264_v3  ;;  %1208 = vmatprep.subr.bf16.mxu0 %v1264_v3 }
  0xa7   :  { %1138 = vmatpush3.bf16.xpose.msra.mxu1 %v1137_v54  ;;  %1210 = vmatpush3.bf16.xpose.msra.mxu0 %v1397_v55 }
  0xa8   :  { %1139 = vmatprep.subr.bf16.mxu1 %v1264_v3  ;;  %1211 = vmatprep.subr.bf16.mxu0 %v1264_v3 }
  0xaf   :  { %1141 = vmatpush3.bf16.xpose.msra.mxu1 %v1140_v62  ;;  %1213 = vmatpush3.bf16.xpose.msra.mxu0 %v1417_v1 }
  0xb0   :  { %1142 = vmatprep.subr.bf16.mxu1 %v1264_v3  ;;  %1214 = vmatprep.subr.bf16.mxu0 %v1264_v3 }
  0xb7   :  { %1144 = vmatpush3.bf16.xpose.msra.mxu1 %v1143_v12  ;;  %1216 = vmatpush3.bf16.xpose.msra.mxu0 %v1443_v17 }
  0xb8   :  { %1145 = vmatprep.subr.bf16.mxu1 %v1264_v3  ;;  %1217 = vmatprep.subr.bf16.mxu0 %v1264_v3 }
  0xbf   :  { %1147 = vmatpush3.bf16.xpose.msra.mxu1 %v1146_v27  ;;  %1219 = vmatpush3.bf16.xpose.msra.mxu0 %v1461_v29 }
  0xc6   :  { %969 = vmatmul.mubr.f32.vlgmr.msra.gmra.mrb[0].mxu1 %v1450_v22  ;;  %1074 = vmatmul.mubr.f32.vlgmr.msra.gmra.mrb[0].mxu0 %v1441_v15 }
 0x199   :  { %v432_v16 = vpop.f32.mrb[0].mxu1  ;;  %v727_v23 = vpop.f32.mrb[0].mxu0 }
 0x19a   :  { %v1220_v24 = vadd.f32 %v432_v16, %v36_v11  ;;  %v970_v32 = vpop.f32.mrb[1].mxu1  ;;  %v1075_v34 = vpop.f32.mrb[1].mxu0 }
 0x19c   :  { %v1221_v35 = vadd.f32 %v1220_v24, %v727_v23 }
 0x19e   :  { %v731_v36 = vrot.slane %v1221_v35, 4 }
 0x1a0   :  { %v732_v37 = vmax.f32 %v1221_v35, %v731_v36 }
 0x1a2   :  { %v733_v3 = vrot.slane %v732_v37, 2 }
 0x1a4   :  { %v734_v39 = vmax.f32 %v732_v37, %v733_v3 }
 0x1a6   :  { %v735_v40 = vrot.slane %v734_v39, 1 }
 0x1a8   :  { %v736_v41 = vmax.f32 %v734_v39, %v735_v40 }
 0x1aa   :  { %v737_v45 = vsub.f32 %v1221_v35, %v736_v41 }
 0x1ac   :  { %v738_v46 = vmul.f32 1.442695, %v737_v45 }
 0x1ae   :  { %1236 = vpow2.f32 %v738_v46 }
 0x1b8   :  { %v1237_v47 = vpop.eup %1236 }
 0x1b9   :  { %v740_v48 = vrot.slane %v1237_v47, 4 }
 0x1bb   :  { %v741_v49 = vadd.f32 %v1237_v47, %v740_v48 }
 0x1bd   :  { %v742_v50 = vrot.slane %v741_v49, 2 }
 0x1bf   :  { %v743_v53 = vadd.f32 %v742_v50, %v741_v49 }
 0x1c1   :  { %v744_v54 = vrot.slane %v743_v53, 1 }
 0x1c3   :  { %v745_v55 = vadd.f32 %v744_v54, %v743_v53 }
 0x1c5   :  { %1238 = vlog2.f32 %v745_v55 }
 0x1cf   :  { %v1239_v58 = vpop.eup %1238 }
 0x1d0   :  { %v747_v59 = vmul.f32 0.6931472, %v1239_v58 }
 0x1d2   :  { %v748_v62 = vsub.f32 %v737_v45, %v747_v59 }
 0x1d4   :  { %749 = vst [vmem:[#allocation2] sm:$0xff] %v748_v62 }
 0x1d5   :  { %1251 = shalt.err (!%p1248_p4)
}
 0x1d6   :  { %s1252_s23 = scalar_lea.hbm %s1590_s3, 128 }
 0x1d7   :  { %p1253_p5 = scmp.ne.s32.totalorder %s1590_s3, %s1252_s23  ;;  %p1256_p6 = scmp.lt.u32.totalorder %s1252_s23, %s1590_s3 }
 0x1d9   :  { %p1258_p7 = pnand %p1256_p6, %p1253_p5 }
 0x1db   :  { %1261 = shalt.err (!%p1258_p7)
}
 0x1dc   :  { %759 = dma.vmem_to_hbm [thread:$0]  %s757_s19, 128, %s1590_s3, [#allocation3]  }
 0x1dd   :  { %1262 = dma.done.wait [#allocation3], 128  }
 0x1de   :  { %1263 = vsyncadd [#allocation3], 4294967168 }
 0x1df   :  { %763 = vsyncpa [#allocation3], 1 }

</bundles_post_ra>
